<compile_context>
chip_gen: v7x
topology: tpu7x:2x2x1
jax: 0.10.0
libtpu: 0.0.40
codegen_flags: <defaults>
</compile_context>

<pallas_src>
import numpy as np
import jax
import jax.numpy as jnp
from jax.experimental import pallas as pl
from jax.experimental.pallas import tpu as pltpu

EPS = 1e-5


def _round_up(v, m):
    return (v + m - 1) // m * m


def _build_patches(x_cl, mask_ref, p_ref, *, cp, width):
    """Fills the (9*cp, L) bf16 im2col patch scratch for a 3x3/s1/p1 conv.

    x_cl    : (cp, L) f32 value; lanes are the flattened (h, w) positions of
              ONE image, so circular lane rolls never mix images.
    mask_ref: (9, L) f32 {0,1} boundary masks (precomputed in the wrapper).
    p_ref   : (9*cp, L) bf16 VMEM scratch; row t*cp + ci holds tap
              t = kh*3 + kw of input channel ci.  Fully overwritten each call.
    """
    L = x_cl.shape[1]
    t = 0
    for dh in (-1, 0, 1):
        # one long roll per dh, reused by the three dw taps (fewer XLU rolls)
        row = x_cl if dh == 0 else pltpu.roll(x_cl, (-dh * width) % L, axis=1)
        for dw in (-1, 0, 1):
            shifted = row if dw == 0 else pltpu.roll(row, (-dw) % L, axis=1)
            if dh == 0 and dw == 0:
                val = shifted                        # centre tap: mask is all ones
            else:
                val = shifted * mask_ref[t:t + 1, :]  # single vmul per tap
            p_ref[t * cp:(t + 1) * cp, :] = val.astype(p_ref.dtype)
            t += 1


def _store_channel_sums(y_ref, st_ref, c):
    """Per-channel (sum, sum_sq) partials for this image.

    Re-reads the conv result from VMEM (after its store) so the full (C, L)
    matmul result + y*y temporary need not stay live in vregs.
    """
    yv = y_ref[0:c, :]
    st_ref[:, 0:1] = jnp.sum(yv, axis=1, keepdims=True)
    st_ref[:, 1:2] = jnp.sum(yv * yv, axis=1, keepdims=True)


@jax.jit
def residual_block(x_nchw, w1_oihw, w2_oihw, gamma1, beta1, gamma2, beta2):
    """x_nchw: (N, C, H, W) like PyTorch; returns (N, C, H, W)."""
    N, C, H, W = x_nchw.shape
    L = H * W
    Cp = _round_up(C, 8)                 # sublane-aligned channel count
    count = float(N * L)

    # ---- layout plumbing (all free / tiny) ----------------------------------
    x_flat = x_nchw.astype(jnp.float32).reshape(N, C, L)   # NCHW is contiguous
    x_in = x_flat if Cp == C else jnp.pad(x_flat, ((0, 0), (0, Cp - C), (0, 0)))

    # 3x3 boundary masks depend only on (h, w) -> compile-time constant (9, L)
    hh = np.arange(H)[:, None]
    ww = np.arange(W)[None, :]
    mask_rows = []
    for dh in (-1, 0, 1):
        for dw in (-1, 0, 1):
            ok = ((hh + dh >= 0) & (hh + dh < H) &
                  (ww + dw >= 0) & (ww + dw < W))
            mask_rows.append(ok.reshape(-1))
    mask = jnp.asarray(np.stack(mask_rows, 0).astype(np.float32))   # (9, L)

    # OIHW -> (c_out_pad, 9*Cp) bf16; column = (kh*3 + kw)*Cp + ci, matching
    # the patch-row order of _build_patches.  Pad rows/cols are zero.
    def pack_weight(w_oihw, c_out_pad):
        wt = jnp.transpose(w_oihw.astype(jnp.float32), (0, 2, 3, 1))  # (O,3,3,I)
        wt = jnp.pad(wt, ((0, c_out_pad - C), (0, 0), (0, 0), (0, Cp - C)))
        return wt.reshape(c_out_pad, 9 * Cp).astype(jnp.bfloat16)

    w1p = pack_weight(w1_oihw, Cp)   # pad output channels too -> y1 pad rows == 0
    w2p = pack_weight(w2_oihw, C)

    # ---- specs / shapes ------------------------------------------------------
    spec_xp = pl.BlockSpec((None, Cp, L), lambda i: (i, 0, 0))   # padded acts
    spec_c = pl.BlockSpec((None, C, L), lambda i: (i, 0, 0))     # real-C acts
    spec_mask = pl.BlockSpec((9, L), lambda i: (0, 0))
    spec_w1 = pl.BlockSpec((Cp, 9 * Cp), lambda i: (0, 0))
    spec_w2 = pl.BlockSpec((C, 9 * Cp), lambda i: (0, 0))
    spec_affp = pl.BlockSpec((Cp, 2), lambda i: (0, 0))
    spec_aff = pl.BlockSpec((C, 2), lambda i: (0, 0))
    spec_st = pl.BlockSpec((None, C, 2), lambda i: (i, 0, 0))

    shape_yp = jax.ShapeDtypeStruct((N, Cp, L), jnp.float32)
    shape_y = jax.ShapeDtypeStruct((N, C, L), jnp.float32)
    shape_st = jax.ShapeDtypeStruct((N, C, 2), jnp.float32)

    patch_scratch = [pltpu.VMEM((9 * Cp, L), jnp.bfloat16)]

    # per-pass live VMEM estimate: 2x in-act + 2x out-act (f32, double-buffered)
    # + bf16 im2col scratch + weights.  Sized so it also fits v7x (64 MiB).
    est_vmem = (4 * Cp * L * 4) + (9 * Cp * L * 2) + (4 * Cp * 9 * Cp * 2)
    cparams = pltpu.CompilerParams(
        dimension_semantics=("parallel",),
        vmem_limit_bytes=int(min(64 * 2 ** 20, max(32 * 2 ** 20, 2 * est_vmem))),
    )

    # ---- pass 1: conv1 + per-image BN1 partial sums --------------------------
    def conv1_kernel(x_ref, mask_ref, w_ref, y_ref, st_ref, p_ref):
        _build_patches(x_ref[...], mask_ref, p_ref, cp=Cp, width=W)
        y_ref[...] = jnp.dot(w_ref[...], p_ref[...],
                             preferred_element_type=jnp.float32)
        _store_channel_sums(y_ref, st_ref, C)

    y1, st1 = pl.pallas_call(
        conv1_kernel,
        grid=(N,),
        in_specs=[spec_xp, spec_mask, spec_w1],
        out_specs=(spec_xp, spec_st),
        out_shape=(shape_yp, shape_st),
        scratch_shapes=patch_scratch,
        compiler_params=cparams,
    )(x_in, mask, w1p)

    # fold BN statistics + gamma/beta into per-channel (scale, shift), f32
    def bn_affine(st, gamma, beta, pad_to):
        s = jnp.sum(st, axis=0)                         # (C, 2) cross-image sum
        mean = s[:, 0] / count
        var = s[:, 1] / count - mean * mean             # biased (training mode)
        scale = gamma.astype(jnp.float32) / jnp.sqrt(var + EPS)
        shift = beta.astype(jnp.float32) - mean * scale
        aff = jnp.stack([scale, shift], axis=1)         # (C, 2)
        if pad_to > C:
            aff = jnp.pad(aff, ((0, pad_to - C), (0, 0)))
        return aff

    aff1 = bn_affine(st1, gamma1, beta1, Cp)

    # ---- pass 2: bn1 + relu + conv2 + per-image BN2 partial sums --------------
    def conv2_kernel(y1_ref, aff_ref, mask_ref, w_ref, y_ref, st_ref, p_ref):
        h = jnp.maximum(y1_ref[...] * aff_ref[:, 0:1] + aff_ref[:, 1:2], 0.0)
        _build_patches(h, mask_ref, p_ref, cp=Cp, width=W)
        y_ref[...] = jnp.dot(w_ref[...], p_ref[...],
                             preferred_element_type=jnp.float32)
        _store_channel_sums(y_ref, st_ref, C)

    y2, st2 = pl.pallas_call(
        conv2_kernel,
        grid=(N,),
        in_specs=[spec_xp, spec_affp, spec_mask, spec_w2],
        out_specs=(spec_c, spec_st),
        out_shape=(shape_y, shape_st),
        scratch_shapes=patch_scratch,
        compiler_params=cparams,
    )(y1, aff1, mask, w2p)

    aff2 = bn_affine(st2, gamma2, beta2, C)

    # ---- pass 3: bn2 + residual add + relu (elementwise) ----------------------
    def finish_kernel(y2_ref, x_ref, aff_ref, o_ref):
        o_ref[...] = jnp.maximum(
            y2_ref[...] * aff_ref[:, 0:1] + aff_ref[:, 1:2] + x_ref[...], 0.0)

    out_flat = pl.pallas_call(
        finish_kernel,
        grid=(N,),
        in_specs=[spec_c, spec_c, spec_aff],
        out_specs=spec_c,
        out_shape=shape_y,
        input_output_aliases={0: 0},     # write the result over the y2 buffer
        compiler_params=cparams,
    )(y2, x_flat, aff2)

    return out_flat.reshape(N, C, H, W)


def reference_residual_block(x, w1, w2, g1, b1, g2, b2):
    """Pure-JAX f32 reference (NCHW), mirrors the PyTorch training-mode forward."""
    def conv(y, w):
        return jax.lax.conv_general_dilated(
            y, w, window_strides=(1, 1), padding=((1, 1), (1, 1)),
            dimension_numbers=("NCHW", "OIHW", "NCHW"))

    def bn(y, g, b):
        mean = y.mean(axis=(0, 2, 3), keepdims=True)
        var = ((y - mean) ** 2).mean(axis=(0, 2, 3), keepdims=True)
        return ((y - mean) / jnp.sqrt(var + EPS) * g.reshape(1, -1, 1, 1)
                + b.reshape(1, -1, 1, 1))

    out = jax.nn.relu(bn(conv(x, w1), g1, b1))
    out = bn(conv(out, w2), g2, b2) + x
    return jax.nn.relu(out)


if __name__ == "__main__":
    N, C, H, W = 2, 4, 16, 16
    key = jax.random.PRNGKey(0)
    kx, k1, k2, kg1, kb1, kg2, kb2 = jax.random.split(key, 7)

    x = jax.random.normal(kx, (N, C, H, W), dtype=jnp.float32)
    # conv weights in PyTorch OIHW layout, deterministic init
    w1 = 0.1 * jax.random.normal(k1, (C, C, 3, 3), dtype=jnp.float32)
    w2 = 0.1 * jax.random.normal(k2, (C, C, 3, 3), dtype=jnp.float32)
    gamma1 = 1.0 + 0.1 * jax.random.normal(kg1, (C,), dtype=jnp.float32)
    beta1 = 0.1 * jax.random.normal(kb1, (C,), dtype=jnp.float32)
    gamma2 = 1.0 + 0.1 * jax.random.normal(kg2, (C,), dtype=jnp.float32)
    beta2 = 0.1 * jax.random.normal(kb2, (C,), dtype=jnp.float32)

    out = residual_block(x, w1, w2, gamma1, beta1, gamma2, beta2)
    out = jax.block_until_ready(out)

    ref = reference_residual_block(x, w1, w2, gamma1, beta1, gamma2, beta2)
    ref = jax.block_until_ready(ref)

    assert out.shape == (N, C, H, W)
    max_diff = float(jnp.max(jnp.abs(out - ref)))
    # bf16 MXU operands (f32 accumulation) vs. the all-f32 reference: a few
    # 1e-3..1e-2 of error is expected after two conv + BN (1/std) stages.
    assert jnp.allclose(out, ref, atol=2e-2, rtol=2e-2), (
        f"max abs diff = {max_diff}")

    print("KERNEL_OK")
</pallas_src>

<mosaic_0001>
module attributes {stable_mosaic.version = 11 : i64} {
  func.func @conv1_kernel(%arg0: i32, %arg1: memref<1x8x256xf32, #tpu.memory_space<vmem>>, %arg2: memref<9x256xf32, #tpu.memory_space<vmem>>, %arg3: memref<8x72xbf16, #tpu.memory_space<vmem>>, %arg4: memref<1x8x256xf32, #tpu.memory_space<vmem>>, %arg5: memref<1x4x2xf32, #tpu.memory_space<vmem>>, %arg6: memref<72x256xbf16, #tpu.memory_space<vmem>>) attributes {dimension_semantics = [#tpu.dimension_semantics<parallel>], iteration_bounds = array<i64: 2>, scalar_prefetch = 0 : i64, scratch_operands = 1 : i64, tpu.core_type = #tpu.core_type<tc>, window_params = [{transform_indices = @transform_0, window_bounds = array<i64: 1, 8, 256>}, {pipeline_mode = #tpu.pipeline_mode<synchronous>, transform_indices = @transform_1, window_bounds = array<i64: 9, 256>}, {pipeline_mode = #tpu.pipeline_mode<synchronous>, transform_indices = @transform_2, window_bounds = array<i64: 8, 72>}, {transform_indices = @transform_3, window_bounds = array<i64: 1, 8, 256>}, {transform_indices = @transform_4, window_bounds = array<i64: 1, 4, 2>}]} {
    %c0 = arith.constant 0 : index
    %c0_0 = arith.constant 0 : index
    %c0_1 = arith.constant 0 : index
    %0 = vector.load %arg1[%c0, %c0_0, %c0_1] : memref<1x8x256xf32, #tpu.memory_space<vmem>>, vector<1x8x256xf32>
    %1 = vector.shape_cast %0 : vector<1x8x256xf32> to vector<8x256xf32>
    %c16_i32 = arith.constant 16 : i32
    %2 = tpu.dynamic_rotate %1 by %c16_i32 dim 1 : vector<8x256xf32>, i32 -> vector<8x256xf32>
    %c1_i32 = arith.constant 1 : i32
    %3 = tpu.dynamic_rotate %2 by %c1_i32 dim 1 : vector<8x256xf32>, i32 -> vector<8x256xf32>
    %c0_2 = arith.constant 0 : index
    %c0_3 = arith.constant 0 : index
    %4 = vector.load %arg2[%c0_2, %c0_3] : memref<9x256xf32, #tpu.memory_space<vmem>>, vector<1x256xf32>
    %5 = vector.broadcast %4 : vector<1x256xf32> to vector<8x256xf32>
    %6 = arith.mulf %3, %5 : vector<8x256xf32>
    %7 = arith.truncf %6 : vector<8x256xf32> to vector<8x256xbf16>
    %c0_4 = arith.constant 0 : index
    %c0_5 = arith.constant 0 : index
    %8 = vector.load %arg6[%c0_4, %c0_5] : memref<72x256xbf16, #tpu.memory_space<vmem>>, vector<8x256xbf16>
    tpu.vector_store %arg6[%c0_4, %c0_5], %7 {strides = array<i32>} : memref<72x256xbf16, #tpu.memory_space<vmem>>, vector<8x256xbf16>,
    %c1 = arith.constant 1 : index
    %c0_6 = arith.constant 0 : index
    %9 = vector.load %arg2[%c1, %c0_6] : memref<9x256xf32, #tpu.memory_space<vmem>>, vector<1x256xf32>
    %10 = vector.broadcast %9 : vector<1x256xf32> to vector<8x256xf32>
    %11 = arith.mulf %2, %10 : vector<8x256xf32>
    %12 = arith.truncf %11 : vector<8x256xf32> to vector<8x256xbf16>
    %c8 = arith.constant 8 : index
    %c0_7 = arith.constant 0 : index
    %13 = vector.load %arg6[%c8, %c0_7] : memref<72x256xbf16, #tpu.memory_space<vmem>>, vector<8x256xbf16>
    tpu.vector_store %arg6[%c8, %c0_7], %12 {strides = array<i32>} : memref<72x256xbf16, #tpu.memory_space<vmem>>, vector<8x256xbf16>,
    %c255_i32 = arith.constant 255 : i32
    %14 = tpu.dynamic_rotate %2 by %c255_i32 dim 1 : vector<8x256xf32>, i32 -> vector<8x256xf32>
    %c2 = arith.constant 2 : index
    %c0_8 = arith.constant 0 : index
    %15 = vector.load %arg2[%c2, %c0_8] : memref<9x256xf32, #tpu.memory_space<vmem>>, vector<1x256xf32>
    %16 = vector.broadcast %15 : vector<1x256xf32> to vector<8x256xf32>
    %17 = arith.mulf %14, %16 : vector<8x256xf32>
    %18 = arith.truncf %17 : vector<8x256xf32> to vector<8x256xbf16>
    %c16 = arith.constant 16 : index
    %c0_9 = arith.constant 0 : index
    %19 = vector.load %arg6[%c16, %c0_9] : memref<72x256xbf16, #tpu.memory_space<vmem>>, vector<8x256xbf16>
    tpu.vector_store %arg6[%c16, %c0_9], %18 {strides = array<i32>} : memref<72x256xbf16, #tpu.memory_space<vmem>>, vector<8x256xbf16>,
    %c1_i32_10 = arith.constant 1 : i32
    %20 = tpu.dynamic_rotate %1 by %c1_i32_10 dim 1 : vector<8x256xf32>, i32 -> vector<8x256xf32>
    %c3 = arith.constant 3 : index
    %c0_11 = arith.constant 0 : index
    %21 = vector.load %arg2[%c3, %c0_11] : memref<9x256xf32, #tpu.memory_space<vmem>>, vector<1x256xf32>
    %22 = vector.broadcast %21 : vector<1x256xf32> to vector<8x256xf32>
    %23 = arith.mulf %20, %22 : vector<8x256xf32>
    %24 = arith.truncf %23 : vector<8x256xf32> to vector<8x256xbf16>
    %c24 = arith.constant 24 : index
    %c0_12 = arith.constant 0 : index
    %25 = vector.load %arg6[%c24, %c0_12] : memref<72x256xbf16, #tpu.memory_space<vmem>>, vector<8x256xbf16>
    tpu.vector_store %arg6[%c24, %c0_12], %24 {strides = array<i32>} : memref<72x256xbf16, #tpu.memory_space<vmem>>, vector<8x256xbf16>,
    %26 = arith.truncf %1 : vector<8x256xf32> to vector<8x256xbf16>
    %c32 = arith.constant 32 : index
    %c0_13 = arith.constant 0 : index
    %27 = vector.load %arg6[%c32, %c0_13] : memref<72x256xbf16, #tpu.memory_space<vmem>>, vector<8x256xbf16>
    tpu.vector_store %arg6[%c32, %c0_13], %26 {strides = array<i32>} : memref<72x256xbf16, #tpu.memory_space<vmem>>, vector<8x256xbf16>,
    %c255_i32_14 = arith.constant 255 : i32
    %28 = tpu.dynamic_rotate %1 by %c255_i32_14 dim 1 : vector<8x256xf32>, i32 -> vector<8x256xf32>
    %c5 = arith.constant 5 : index
    %c0_15 = arith.constant 0 : index
    %29 = vector.load %arg2[%c5, %c0_15] : memref<9x256xf32, #tpu.memory_space<vmem>>, vector<1x256xf32>
    %30 = vector.broadcast %29 : vector<1x256xf32> to vector<8x256xf32>
    %31 = arith.mulf %28, %30 : vector<8x256xf32>
    %32 = arith.truncf %31 : vector<8x256xf32> to vector<8x256xbf16>
    %c40 = arith.constant 40 : index
    %c0_16 = arith.constant 0 : index
    %33 = vector.load %arg6[%c40, %c0_16] : memref<72x256xbf16, #tpu.memory_space<vmem>>, vector<8x256xbf16>
    tpu.vector_store %arg6[%c40, %c0_16], %32 {strides = array<i32>} : memref<72x256xbf16, #tpu.memory_space<vmem>>, vector<8x256xbf16>,
    %c240_i32 = arith.constant 240 : i32
    %34 = tpu.dynamic_rotate %1 by %c240_i32 dim 1 : vector<8x256xf32>, i32 -> vector<8x256xf32>
    %c1_i32_17 = arith.constant 1 : i32
    %35 = tpu.dynamic_rotate %34 by %c1_i32_17 dim 1 : vector<8x256xf32>, i32 -> vector<8x256xf32>
    %c6 = arith.constant 6 : index
    %c0_18 = arith.constant 0 : index
    %36 = vector.load %arg2[%c6, %c0_18] : memref<9x256xf32, #tpu.memory_space<vmem>>, vector<1x256xf32>
    %37 = vector.broadcast %36 : vector<1x256xf32> to vector<8x256xf32>
    %38 = arith.mulf %35, %37 : vector<8x256xf32>
    %39 = arith.truncf %38 : vector<8x256xf32> to vector<8x256xbf16>
    %c48 = arith.constant 48 : index
    %c0_19 = arith.constant 0 : index
    %40 = vector.load %arg6[%c48, %c0_19] : memref<72x256xbf16, #tpu.memory_space<vmem>>, vector<8x256xbf16>
    tpu.vector_store %arg6[%c48, %c0_19], %39 {strides = array<i32>} : memref<72x256xbf16, #tpu.memory_space<vmem>>, vector<8x256xbf16>,
    %c7 = arith.constant 7 : index
    %c0_20 = arith.constant 0 : index
    %41 = vector.load %arg2[%c7, %c0_20] : memref<9x256xf32, #tpu.memory_space<vmem>>, vector<1x256xf32>
    %42 = vector.broadcast %41 : vector<1x256xf32> to vector<8x256xf32>
    %43 = arith.mulf %34, %42 : vector<8x256xf32>
    %44 = arith.truncf %43 : vector<8x256xf32> to vector<8x256xbf16>
    %c56 = arith.constant 56 : index
    %c0_21 = arith.constant 0 : index
    %45 = vector.load %arg6[%c56, %c0_21] : memref<72x256xbf16, #tpu.memory_space<vmem>>, vector<8x256xbf16>
    tpu.vector_store %arg6[%c56, %c0_21], %44 {strides = array<i32>} : memref<72x256xbf16, #tpu.memory_space<vmem>>, vector<8x256xbf16>,
    %c255_i32_22 = arith.constant 255 : i32
    %46 = tpu.dynamic_rotate %34 by %c255_i32_22 dim 1 : vector<8x256xf32>, i32 -> vector<8x256xf32>
    %c8_23 = arith.constant 8 : index
    %c0_24 = arith.constant 0 : index
    %47 = vector.load %arg2[%c8_23, %c0_24] : memref<9x256xf32, #tpu.memory_space<vmem>>, vector<1x256xf32>
    %48 = vector.broadcast %47 : vector<1x256xf32> to vector<8x256xf32>
    %49 = arith.mulf %46, %48 : vector<8x256xf32>
    %50 = arith.truncf %49 : vector<8x256xf32> to vector<8x256xbf16>
    %c64 = arith.constant 64 : index
    %c0_25 = arith.constant 0 : index
    %51 = vector.load %arg6[%c64, %c0_25] : memref<72x256xbf16, #tpu.memory_space<vmem>>, vector<8x256xbf16>
    tpu.vector_store %arg6[%c64, %c0_25], %50 {strides = array<i32>} : memref<72x256xbf16, #tpu.memory_space<vmem>>, vector<8x256xbf16>,
    %c0_26 = arith.constant 0 : index
    %c0_27 = arith.constant 0 : index
    %52 = vector.load %arg3[%c0_26, %c0_27] : memref<8x72xbf16, #tpu.memory_space<vmem>>, vector<8x72xbf16>
    %c0_28 = arith.constant 0 : index
    %c0_29 = arith.constant 0 : index
    %53 = vector.load %arg6[%c0_28, %c0_29] : memref<72x256xbf16, #tpu.memory_space<vmem>>, vector<72x256xbf16>
    %cst = arith.constant dense<0.000000e+00> : vector<8x256xf32>
    %54 = tpu.matmul %52, %53, %cst {dimension_numbers = #tpu.dot_dimension_numbers<[1], [0], [0], [1], [0, 0, 1, 1], [], []>} : vector<8x72xbf16>, vector<72x256xbf16>, vector<8x256xf32> -> vector<8x256xf32>
    %c0_30 = arith.constant 0 : index
    %c0_31 = arith.constant 0 : index
    %c0_32 = arith.constant 0 : index
    %55 = vector.load %arg4[%c0_30, %c0_31, %c0_32] : memref<1x8x256xf32, #tpu.memory_space<vmem>>, vector<1x8x256xf32>
    %56 = vector.shape_cast %55 : vector<1x8x256xf32> to vector<8x256xf32>
    %57 = vector.shape_cast %54 : vector<8x256xf32> to vector<1x8x256xf32>
    tpu.vector_store %arg4[%c0_30, %c0_31, %c0_32], %57 {strides = array<i32>} : memref<1x8x256xf32, #tpu.memory_space<vmem>>, vector<1x8x256xf32>,
    %c0_33 = arith.constant 0 : index
    %c0_34 = arith.constant 0 : index
    %c0_35 = arith.constant 0 : index
    %58 = vector.load %arg4[%c0_33, %c0_34, %c0_35] : memref<1x8x256xf32, #tpu.memory_space<vmem>>, vector<1x4x256xf32>
    %59 = vector.shape_cast %58 : vector<1x4x256xf32> to vector<4x256xf32>
    %cst_36 = arith.constant dense<0.000000e+00> : vector<4xf32>
    %60 = vector.multi_reduction <add>, %59, %cst_36 [1] : vector<4x256xf32> to vector<4xf32>
    %61 = vector.shape_cast %60 : vector<4xf32> to vector<4x1xf32>
    %c0_37 = arith.constant 0 : index
    %c0_38 = arith.constant 0 : index
    %c0_39 = arith.constant 0 : index
    %62 = vector.load %arg5[%c0_37, %c0_38, %c0_39] : memref<1x4x2xf32, #tpu.memory_space<vmem>>, vector<1x4x1xf32>
    %63 = vector.shape_cast %62 : vector<1x4x1xf32> to vector<4x1xf32>
    %64 = vector.shape_cast %61 : vector<4x1xf32> to vector<1x4x1xf32>
    tpu.vector_store %arg5[%c0_37, %c0_38, %c0_39], %64 {strides = array<i32>} : memref<1x4x2xf32, #tpu.memory_space<vmem>>, vector<1x4x1xf32>,
    %65 = arith.mulf %59, %59 : vector<4x256xf32>
    %cst_40 = arith.constant dense<0.000000e+00> : vector<4xf32>
    %66 = vector.multi_reduction <add>, %65, %cst_40 [1] : vector<4x256xf32> to vector<4xf32>
    %67 = vector.shape_cast %66 : vector<4xf32> to vector<4x1xf32>
    %c0_41 = arith.constant 0 : index
    %c0_42 = arith.constant 0 : index
    %c1_43 = arith.constant 1 : index
    %68 = vector.load %arg5[%c0_41, %c0_42, %c1_43] : memref<1x4x2xf32, #tpu.memory_space<vmem>>, vector<1x4x1xf32>
    %69 = vector.shape_cast %68 : vector<1x4x1xf32> to vector<4x1xf32>
    %70 = vector.shape_cast %67 : vector<4x1xf32> to vector<1x4x1xf32>
    tpu.vector_store %arg5[%c0_41, %c0_42, %c1_43], %70 {strides = array<i32>} : memref<1x4x2xf32, #tpu.memory_space<vmem>>, vector<1x4x1xf32>,
    return
  }
  func.func @transform_0(%arg0: i32) -> (i32, i32, i32) {
    %c0_i32 = arith.constant 0 : i32
    %c0_i32_0 = arith.constant 0 : i32
    %c0_i32_1 = arith.constant 0 : i32
    return %arg0, %c0_i32, %c0_i32_0 : i32, i32, i32
  }
  func.func @transform_1(%arg0: i32) -> (i32, i32) {
    %c0_i32 = arith.constant 0 : i32
    %c0_i32_0 = arith.constant 0 : i32
    %c0_i32_1 = arith.constant 0 : i32
    return %c0_i32, %c0_i32_0 : i32, i32
  }
  func.func @transform_2(%arg0: i32) -> (i32, i32) {
    %c0_i32 = arith.constant 0 : i32
    %c0_i32_0 = arith.constant 0 : i32
    %c0_i32_1 = arith.constant 0 : i32
    return %c0_i32, %c0_i32_0 : i32, i32
  }
  func.func @transform_3(%arg0: i32) -> (i32, i32, i32) {
    %c0_i32 = arith.constant 0 : i32
    %c0_i32_0 = arith.constant 0 : i32
    %c0_i32_1 = arith.constant 0 : i32
    return %arg0, %c0_i32, %c0_i32_0 : i32, i32, i32
  }
  func.func @transform_4(%arg0: i32) -> (i32, i32, i32) {
    %c0_i32 = arith.constant 0 : i32
    %c0_i32_0 = arith.constant 0 : i32
    %c0_i32_1 = arith.constant 0 : i32
    return %arg0, %c0_i32, %c0_i32_0 : i32, i32, i32
  }
}

module attributes {stable_mosaic.version = 11 : i64} {
  func.func @finish_kernel(%arg0: i32, %arg1: memref<1x4x256xf32, #tpu.memory_space<vmem>>, %arg2: memref<1x4x256xf32, #tpu.memory_space<vmem>>, %arg3: memref<4x2xf32, #tpu.memory_space<vmem>>, %arg4: memref<1x4x256xf32, #tpu.memory_space<vmem>>) attributes {dimension_semantics = [#tpu.dimension_semantics<parallel>], iteration_bounds = array<i64: 2>, scalar_prefetch = 0 : i64, scratch_operands = 0 : i64, tpu.core_type = #tpu.core_type<tc>, window_params = [{transform_indices = @transform_0, window_bounds = array<i64: 1, 4, 256>}, {transform_indices = @transform_1, window_bounds = array<i64: 1, 4, 256>}, {pipeline_mode = #tpu.pipeline_mode<synchronous>, transform_indices = @transform_2, window_bounds = array<i64: 4, 2>}, {transform_indices = @transform_3, window_bounds = array<i64: 1, 4, 256>}]} {
    %c0 = arith.constant 0 : index
    %c0_0 = arith.constant 0 : index
    %c0_1 = arith.constant 0 : index
    %0 = vector.load %arg1[%c0, %c0_0, %c0_1] : memref<1x4x256xf32, #tpu.memory_space<vmem>>, vector<1x4x256xf32>
    %1 = vector.shape_cast %0 : vector<1x4x256xf32> to vector<4x256xf32>
    %c0_2 = arith.constant 0 : index
    %c0_3 = arith.constant 0 : index
    %2 = vector.load %arg3[%c0_2, %c0_3] : memref<4x2xf32, #tpu.memory_space<vmem>>, vector<4x1xf32>
    %3 = vector.broadcast %2 : vector<4x1xf32> to vector<4x256xf32>
    %4 = arith.mulf %1, %3 : vector<4x256xf32>
    %c0_4 = arith.constant 0 : index
    %c1 = arith.constant 1 : index
    %5 = vector.load %arg3[%c0_4, %c1] : memref<4x2xf32, #tpu.memory_space<vmem>>, vector<4x1xf32>
    %6 = vector.broadcast %5 : vector<4x1xf32> to vector<4x256xf32>
    %7 = arith.addf %4, %6 : vector<4x256xf32>
    %c0_5 = arith.constant 0 : index
    %c0_6 = arith.constant 0 : index
    %c0_7 = arith.constant 0 : index
    %8 = vector.load %arg2[%c0_5, %c0_6, %c0_7] : memref<1x4x256xf32, #tpu.memory_space<vmem>>, vector<1x4x256xf32>
    %9 = vector.shape_cast %8 : vector<1x4x256xf32> to vector<4x256xf32>
    %10 = arith.addf %7, %9 : vector<4x256xf32>
    %cst = arith.constant 0.000000e+00 : f32
    %11 = vector.broadcast %cst : f32 to vector<4x256xf32>
    %12 = arith.maximumf %10, %11 : vector<4x256xf32>
    %c0_8 = arith.constant 0 : index
    %c0_9 = arith.constant 0 : index
    %c0_10 = arith.constant 0 : index
    %13 = vector.load %arg4[%c0_8, %c0_9, %c0_10] : memref<1x4x256xf32, #tpu.memory_space<vmem>>, vector<1x4x256xf32>
    %14 = vector.shape_cast %13 : vector<1x4x256xf32> to vector<4x256xf32>
    %15 = vector.shape_cast %12 : vector<4x256xf32> to vector<1x4x256xf32>
    tpu.vector_store %arg4[%c0_8, %c0_9, %c0_10], %15 {strides = array<i32>} : memref<1x4x256xf32, #tpu.memory_space<vmem>>, vector<1x4x256xf32>,
    return
  }
  func.func @transform_0(%arg0: i32) -> (i32, i32, i32) {
    %c0_i32 = arith.constant 0 : i32
    %c0_i32_0 = arith.constant 0 : i32
    %c0_i32_1 = arith.constant 0 : i32
    return %arg0, %c0_i32, %c0_i32_0 : i32, i32, i32
  }
  func.func @transform_1(%arg0: i32) -> (i32, i32, i32) {
    %c0_i32 = arith.constant 0 : i32
    %c0_i32_0 = arith.constant 0 : i32
    %c0_i32_1 = arith.constant 0 : i32
    return %arg0, %c0_i32, %c0_i32_0 : i32, i32, i32
  }
  func.func @transform_2(%arg0: i32) -> (i32, i32) {
    %c0_i32 = arith.constant 0 : i32
    %c0_i32_0 = arith.constant 0 : i32
    %c0_i32_1 = arith.constant 0 : i32
    return %c0_i32, %c0_i32_0 : i32, i32
  }
  func.func @transform_3(%arg0: i32) -> (i32, i32, i32) {
    %c0_i32 = arith.constant 0 : i32
    %c0_i32_0 = arith.constant 0 : i32
    %c0_i32_1 = arith.constant 0 : i32
    return %arg0, %c0_i32, %c0_i32_0 : i32, i32, i32
  }
}

module attributes {stable_mosaic.version = 11 : i64} {
  func.func @conv2_kernel(%arg0: i32, %arg1: memref<1x8x256xf32, #tpu.memory_space<vmem>>, %arg2: memref<8x2xf32, #tpu.memory_space<vmem>>, %arg3: memref<9x256xf32, #tpu.memory_space<vmem>>, %arg4: memref<4x72xbf16, #tpu.memory_space<vmem>>, %arg5: memref<1x4x256xf32, #tpu.memory_space<vmem>>, %arg6: memref<1x4x2xf32, #tpu.memory_space<vmem>>, %arg7: memref<72x256xbf16, #tpu.memory_space<vmem>>) attributes {dimension_semantics = [#tpu.dimension_semantics<parallel>], iteration_bounds = array<i64: 2>, scalar_prefetch = 0 : i64, scratch_operands = 1 : i64, tpu.core_type = #tpu.core_type<tc>, window_params = [{transform_indices = @transform_0, window_bounds = array<i64: 1, 8, 256>}, {pipeline_mode = #tpu.pipeline_mode<synchronous>, transform_indices = @transform_1, window_bounds = array<i64: 8, 2>}, {pipeline_mode = #tpu.pipeline_mode<synchronous>, transform_indices = @transform_2, window_bounds = array<i64: 9, 256>}, {pipeline_mode = #tpu.pipeline_mode<synchronous>, transform_indices = @transform_3, window_bounds = array<i64: 4, 72>}, {transform_indices = @transform_4, window_bounds = array<i64: 1, 4, 256>}, {transform_indices = @transform_5, window_bounds = array<i64: 1, 4, 2>}]} {
    %c0 = arith.constant 0 : index
    %c0_0 = arith.constant 0 : index
    %c0_1 = arith.constant 0 : index
    %0 = vector.load %arg1[%c0, %c0_0, %c0_1] : memref<1x8x256xf32, #tpu.memory_space<vmem>>, vector<1x8x256xf32>
    %1 = vector.shape_cast %0 : vector<1x8x256xf32> to vector<8x256xf32>
    %c0_2 = arith.constant 0 : index
    %c0_3 = arith.constant 0 : index
    %2 = vector.load %arg2[%c0_2, %c0_3] : memref<8x2xf32, #tpu.memory_space<vmem>>, vector<8x1xf32>
    %3 = vector.broadcast %2 : vector<8x1xf32> to vector<8x256xf32>
    %4 = arith.mulf %1, %3 : vector<8x256xf32>
    %c0_4 = arith.constant 0 : index
    %c1 = arith.constant 1 : index
    %5 = vector.load %arg2[%c0_4, %c1] : memref<8x2xf32, #tpu.memory_space<vmem>>, vector<8x1xf32>
    %6 = vector.broadcast %5 : vector<8x1xf32> to vector<8x256xf32>
    %7 = arith.addf %4, %6 : vector<8x256xf32>
    %cst = arith.constant 0.000000e+00 : f32
    %8 = vector.broadcast %cst : f32 to vector<8x256xf32>
    %9 = arith.maximumf %7, %8 : vector<8x256xf32>
    %c16_i32 = arith.constant 16 : i32
    %10 = tpu.dynamic_rotate %9 by %c16_i32 dim 1 : vector<8x256xf32>, i32 -> vector<8x256xf32>
    %c1_i32 = arith.constant 1 : i32
    %11 = tpu.dynamic_rotate %10 by %c1_i32 dim 1 : vector<8x256xf32>, i32 -> vector<8x256xf32>
    %c0_5 = arith.constant 0 : index
    %c0_6 = arith.constant 0 : index
    %12 = vector.load %arg3[%c0_5, %c0_6] : memref<9x256xf32, #tpu.memory_space<vmem>>, vector<1x256xf32>
    %13 = vector.broadcast %12 : vector<1x256xf32> to vector<8x256xf32>
    %14 = arith.mulf %11, %13 : vector<8x256xf32>
    %15 = arith.truncf %14 : vector<8x256xf32> to vector<8x256xbf16>
    %c0_7 = arith.constant 0 : index
    %c0_8 = arith.constant 0 : index
    %16 = vector.load %arg7[%c0_7, %c0_8] : memref<72x256xbf16, #tpu.memory_space<vmem>>, vector<8x256xbf16>
    tpu.vector_store %arg7[%c0_7, %c0_8], %15 {strides = array<i32>} : memref<72x256xbf16, #tpu.memory_space<vmem>>, vector<8x256xbf16>,
    %c1_9 = arith.constant 1 : index
    %c0_10 = arith.constant 0 : index
    %17 = vector.load %arg3[%c1_9, %c0_10] : memref<9x256xf32, #tpu.memory_space<vmem>>, vector<1x256xf32>
    %18 = vector.broadcast %17 : vector<1x256xf32> to vector<8x256xf32>
    %19 = arith.mulf %10, %18 : vector<8x256xf32>
    %20 = arith.truncf %19 : vector<8x256xf32> to vector<8x256xbf16>
    %c8 = arith.constant 8 : index
    %c0_11 = arith.constant 0 : index
    %21 = vector.load %arg7[%c8, %c0_11] : memref<72x256xbf16, #tpu.memory_space<vmem>>, vector<8x256xbf16>
    tpu.vector_store %arg7[%c8, %c0_11], %20 {strides = array<i32>} : memref<72x256xbf16, #tpu.memory_space<vmem>>, vector<8x256xbf16>,
    %c255_i32 = arith.constant 255 : i32
    %22 = tpu.dynamic_rotate %10 by %c255_i32 dim 1 : vector<8x256xf32>, i32 -> vector<8x256xf32>
    %c2 = arith.constant 2 : index
    %c0_12 = arith.constant 0 : index
    %23 = vector.load %arg3[%c2, %c0_12] : memref<9x256xf32, #tpu.memory_space<vmem>>, vector<1x256xf32>
    %24 = vector.broadcast %23 : vector<1x256xf32> to vector<8x256xf32>
    %25 = arith.mulf %22, %24 : vector<8x256xf32>
    %26 = arith.truncf %25 : vector<8x256xf32> to vector<8x256xbf16>
    %c16 = arith.constant 16 : index
    %c0_13 = arith.constant 0 : index
    %27 = vector.load %arg7[%c16, %c0_13] : memref<72x256xbf16, #tpu.memory_space<vmem>>, vector<8x256xbf16>
    tpu.vector_store %arg7[%c16, %c0_13], %26 {strides = array<i32>} : memref<72x256xbf16, #tpu.memory_space<vmem>>, vector<8x256xbf16>,
    %c1_i32_14 = arith.constant 1 : i32
    %28 = tpu.dynamic_rotate %9 by %c1_i32_14 dim 1 : vector<8x256xf32>, i32 -> vector<8x256xf32>
    %c3 = arith.constant 3 : index
    %c0_15 = arith.constant 0 : index
    %29 = vector.load %arg3[%c3, %c0_15] : memref<9x256xf32, #tpu.memory_space<vmem>>, vector<1x256xf32>
    %30 = vector.broadcast %29 : vector<1x256xf32> to vector<8x256xf32>
    %31 = arith.mulf %28, %30 : vector<8x256xf32>
    %32 = arith.truncf %31 : vector<8x256xf32> to vector<8x256xbf16>
    %c24 = arith.constant 24 : index
    %c0_16 = arith.constant 0 : index
    %33 = vector.load %arg7[%c24, %c0_16] : memref<72x256xbf16, #tpu.memory_space<vmem>>, vector<8x256xbf16>
    tpu.vector_store %arg7[%c24, %c0_16], %32 {strides = array<i32>} : memref<72x256xbf16, #tpu.memory_space<vmem>>, vector<8x256xbf16>,
    %34 = arith.truncf %9 : vector<8x256xf32> to vector<8x256xbf16>
    %c32 = arith.constant 32 : index
    %c0_17 = arith.constant 0 : index
    %35 = vector.load %arg7[%c32, %c0_17] : memref<72x256xbf16, #tpu.memory_space<vmem>>, vector<8x256xbf16>
    tpu.vector_store %arg7[%c32, %c0_17], %34 {strides = array<i32>} : memref<72x256xbf16, #tpu.memory_space<vmem>>, vector<8x256xbf16>,
    %c255_i32_18 = arith.constant 255 : i32
    %36 = tpu.dynamic_rotate %9 by %c255_i32_18 dim 1 : vector<8x256xf32>, i32 -> vector<8x256xf32>
    %c5 = arith.constant 5 : index
    %c0_19 = arith.constant 0 : index
    %37 = vector.load %arg3[%c5, %c0_19] : memref<9x256xf32, #tpu.memory_space<vmem>>, vector<1x256xf32>
    %38 = vector.broadcast %37 : vector<1x256xf32> to vector<8x256xf32>
    %39 = arith.mulf %36, %38 : vector<8x256xf32>
    %40 = arith.truncf %39 : vector<8x256xf32> to vector<8x256xbf16>
    %c40 = arith.constant 40 : index
    %c0_20 = arith.constant 0 : index
    %41 = vector.load %arg7[%c40, %c0_20] : memref<72x256xbf16, #tpu.memory_space<vmem>>, vector<8x256xbf16>
    tpu.vector_store %arg7[%c40, %c0_20], %40 {strides = array<i32>} : memref<72x256xbf16, #tpu.memory_space<vmem>>, vector<8x256xbf16>,
    %c240_i32 = arith.constant 240 : i32
    %42 = tpu.dynamic_rotate %9 by %c240_i32 dim 1 : vector<8x256xf32>, i32 -> vector<8x256xf32>
    %c1_i32_21 = arith.constant 1 : i32
    %43 = tpu.dynamic_rotate %42 by %c1_i32_21 dim 1 : vector<8x256xf32>, i32 -> vector<8x256xf32>
    %c6 = arith.constant 6 : index
    %c0_22 = arith.constant 0 : index
    %44 = vector.load %arg3[%c6, %c0_22] : memref<9x256xf32, #tpu.memory_space<vmem>>, vector<1x256xf32>
    %45 = vector.broadcast %44 : vector<1x256xf32> to vector<8x256xf32>
    %46 = arith.mulf %43, %45 : vector<8x256xf32>
    %47 = arith.truncf %46 : vector<8x256xf32> to vector<8x256xbf16>
    %c48 = arith.constant 48 : index
    %c0_23 = arith.constant 0 : index
    %48 = vector.load %arg7[%c48, %c0_23] : memref<72x256xbf16, #tpu.memory_space<vmem>>, vector<8x256xbf16>
    tpu.vector_store %arg7[%c48, %c0_23], %47 {strides = array<i32>} : memref<72x256xbf16, #tpu.memory_space<vmem>>, vector<8x256xbf16>,
    %c7 = arith.constant 7 : index
    %c0_24 = arith.constant 0 : index
    %49 = vector.load %arg3[%c7, %c0_24] : memref<9x256xf32, #tpu.memory_space<vmem>>, vector<1x256xf32>
    %50 = vector.broadcast %49 : vector<1x256xf32> to vector<8x256xf32>
    %51 = arith.mulf %42, %50 : vector<8x256xf32>
    %52 = arith.truncf %51 : vector<8x256xf32> to vector<8x256xbf16>
    %c56 = arith.constant 56 : index
    %c0_25 = arith.constant 0 : index
    %53 = vector.load %arg7[%c56, %c0_25] : memref<72x256xbf16, #tpu.memory_space<vmem>>, vector<8x256xbf16>
    tpu.vector_store %arg7[%c56, %c0_25], %52 {strides = array<i32>} : memref<72x256xbf16, #tpu.memory_space<vmem>>, vector<8x256xbf16>,
    %c255_i32_26 = arith.constant 255 : i32
    %54 = tpu.dynamic_rotate %42 by %c255_i32_26 dim 1 : vector<8x256xf32>, i32 -> vector<8x256xf32>
    %c8_27 = arith.constant 8 : index
    %c0_28 = arith.constant 0 : index
    %55 = vector.load %arg3[%c8_27, %c0_28] : memref<9x256xf32, #tpu.memory_space<vmem>>, vector<1x256xf32>
    %56 = vector.broadcast %55 : vector<1x256xf32> to vector<8x256xf32>
    %57 = arith.mulf %54, %56 : vector<8x256xf32>
    %58 = arith.truncf %57 : vector<8x256xf32> to vector<8x256xbf16>
    %c64 = arith.constant 64 : index
    %c0_29 = arith.constant 0 : index
    %59 = vector.load %arg7[%c64, %c0_29] : memref<72x256xbf16, #tpu.memory_space<vmem>>, vector<8x256xbf16>
    tpu.vector_store %arg7[%c64, %c0_29], %58 {strides = array<i32>} : memref<72x256xbf16, #tpu.memory_space<vmem>>, vector<8x256xbf16>,
    %c0_30 = arith.constant 0 : index
    %c0_31 = arith.constant 0 : index
    %60 = vector.load %arg4[%c0_30, %c0_31] : memref<4x72xbf16, #tpu.memory_space<vmem>>, vector<4x72xbf16>
    %c0_32 = arith.constant 0 : index
    %c0_33 = arith.constant 0 : index
    %61 = vector.load %arg7[%c0_32, %c0_33] : memref<72x256xbf16, #tpu.memory_space<vmem>>, vector<72x256xbf16>
    %cst_34 = arith.constant dense<0.000000e+00> : vector<4x256xf32>
    %62 = tpu.matmul %60, %61, %cst_34 {dimension_numbers = #tpu.dot_dimension_numbers<[1], [0], [0], [1], [0, 0, 1, 1], [], []>} : vector<4x72xbf16>, vector<72x256xbf16>, vector<4x256xf32> -> vector<4x256xf32>
    %c0_35 = arith.constant 0 : index
    %c0_36 = arith.constant 0 : index
    %c0_37 = arith.constant 0 : index
    %63 = vector.load %arg5[%c0_35, %c0_36, %c0_37] : memref<1x4x256xf32, #tpu.memory_space<vmem>>, vector<1x4x256xf32>
    %64 = vector.shape_cast %63 : vector<1x4x256xf32> to vector<4x256xf32>
    %65 = vector.shape_cast %62 : vector<4x256xf32> to vector<1x4x256xf32>
    tpu.vector_store %arg5[%c0_35, %c0_36, %c0_37], %65 {strides = array<i32>} : memref<1x4x256xf32, #tpu.memory_space<vmem>>, vector<1x4x256xf32>,
    %c0_38 = arith.constant 0 : index
    %c0_39 = arith.constant 0 : index
    %c0_40 = arith.constant 0 : index
    %66 = vector.load %arg5[%c0_38, %c0_39, %c0_40] : memref<1x4x256xf32, #tpu.memory_space<vmem>>, vector<1x4x256xf32>
    %67 = vector.shape_cast %66 : vector<1x4x256xf32> to vector<4x256xf32>
    %cst_41 = arith.constant dense<0.000000e+00> : vector<4xf32>
    %68 = vector.multi_reduction <add>, %67, %cst_41 [1] : vector<4x256xf32> to vector<4xf32>
    %69 = vector.shape_cast %68 : vector<4xf32> to vector<4x1xf32>
    %c0_42 = arith.constant 0 : index
    %c0_43 = arith.constant 0 : index
    %c0_44 = arith.constant 0 : index
    %70 = vector.load %arg6[%c0_42, %c0_43, %c0_44] : memref<1x4x2xf32, #tpu.memory_space<vmem>>, vector<1x4x1xf32>
    %71 = vector.shape_cast %70 : vector<1x4x1xf32> to vector<4x1xf32>
    %72 = vector.shape_cast %69 : vector<4x1xf32> to vector<1x4x1xf32>
    tpu.vector_store %arg6[%c0_42, %c0_43, %c0_44], %72 {strides = array<i32>} : memref<1x4x2xf32, #tpu.memory_space<vmem>>, vector<1x4x1xf32>,
    %73 = arith.mulf %67, %67 : vector<4x256xf32>
    %cst_45 = arith.constant dense<0.000000e+00> : vector<4xf32>
    %74 = vector.multi_reduction <add>, %73, %cst_45 [1] : vector<4x256xf32> to vector<4xf32>
    %75 = vector.shape_cast %74 : vector<4xf32> to vector<4x1xf32>
    %c0_46 = arith.constant 0 : index
    %c0_47 = arith.constant 0 : index
    %c1_48 = arith.constant 1 : index
    %76 = vector.load %arg6[%c0_46, %c0_47, %c1_48] : memref<1x4x2xf32, #tpu.memory_space<vmem>>, vector<1x4x1xf32>
    %77 = vector.shape_cast %76 : vector<1x4x1xf32> to vector<4x1xf32>
    %78 = vector.shape_cast %75 : vector<4x1xf32> to vector<1x4x1xf32>
    tpu.vector_store %arg6[%c0_46, %c0_47, %c1_48], %78 {strides = array<i32>} : memref<1x4x2xf32, #tpu.memory_space<vmem>>, vector<1x4x1xf32>,
    return
  }
  func.func @transform_0(%arg0: i32) -> (i32, i32, i32) {
    %c0_i32 = arith.constant 0 : i32
    %c0_i32_0 = arith.constant 0 : i32
    %c0_i32_1 = arith.constant 0 : i32
    return %arg0, %c0_i32, %c0_i32_0 : i32, i32, i32
  }
  func.func @transform_1(%arg0: i32) -> (i32, i32) {
    %c0_i32 = arith.constant 0 : i32
    %c0_i32_0 = arith.constant 0 : i32
    %c0_i32_1 = arith.constant 0 : i32
    return %c0_i32, %c0_i32_0 : i32, i32
  }
  func.func @transform_2(%arg0: i32) -> (i32, i32) {
    %c0_i32 = arith.constant 0 : i32
    %c0_i32_0 = arith.constant 0 : i32
    %c0_i32_1 = arith.constant 0 : i32
    return %c0_i32, %c0_i32_0 : i32, i32
  }
  func.func @transform_3(%arg0: i32) -> (i32, i32) {
    %c0_i32 = arith.constant 0 : i32
    %c0_i32_0 = arith.constant 0 : i32
    %c0_i32_1 = arith.constant 0 : i32
    return %c0_i32, %c0_i32_0 : i32, i32
  }
  func.func @transform_4(%arg0: i32) -> (i32, i32, i32) {
    %c0_i32 = arith.constant 0 : i32
    %c0_i32_0 = arith.constant 0 : i32
    %c0_i32_1 = arith.constant 0 : i32
    return %arg0, %c0_i32, %c0_i32_0 : i32, i32, i32
  }
  func.func @transform_5(%arg0: i32) -> (i32, i32, i32) {
    %c0_i32 = arith.constant 0 : i32
    %c0_i32_0 = arith.constant 0 : i32
    %c0_i32_1 = arith.constant 0 : i32
    return %arg0, %c0_i32, %c0_i32_0 : i32, i32, i32
  }
}

</mosaic_0001>

<bundles_post_ra>
// kernel: residual_block.5
= control target key start
LH: loop header
LB: loop body
LE: loop exit
PB: predicated region body
PF: predicated region fallthrough
CT: control target
= control target key end

     0   :  { %s349_s12 = smov 0   ;;  %s372_s0 = inlined_call_operand.vmem [shape: f32[2,4,256], index: 0, kind: input, shape index: {}, may-alias: {0,3}]   ;;  %s373_s1 = inlined_call_operand.vmem [shape: f32[2,4,256], index: 1, kind: input, shape index: {}]   ;;  %s374_s2 = inlined_call_operand.vmem [shape: f32[4,2], index: 2, kind: input, shape index: {}]   ;;  %s375_s3 = inlined_call_operand.vmem [shape: f32[2,4,256], index: 3, kind: output, shape index: {}, may-alias: {0,3}]  }
   0x1 LB: > { %s289_s13 = sadd.s32 4294967295, %s324_s12   ;;  %p293_p0 = scmp.ge.s32.totalorder %s324_s12, 1  ;;  %s324_s12 = sphi %s349_s12, %s13_s12  }
   0x2   : > { %p147_p1 = scmp.lt.s32.totalorder %s324_s12, 3 }
   0x4   : > { %p148_p2 = pnand %p293_p0, %p147_p1 }
   0x5   : > { %v192_v0 = vld [vmem:[%s374_s2] sm:$0xf] (!%p148_p2)  ;;  %v326_v1 = vmov (!%p148_p2), 0   ;;  %v327_v2 = vmov (!%p148_p2), 1   ;;  %p176_p3 = scmp.lt.s32.totalorder (!%p148_p2), %s289_s13, 1  ;;  %v200_v5 = vlaneseq (!%p148_p2) }
   0x6   : > { %151 = sbr.rel (%p148_p2) target bundleno = 149 (0x95), region = 32  ;;  %316 = vset.pattern.permute.xlu0 (!%p148_p2), %v326_v1  ;;  %v328_v3 = vmov (!%p148_p2), 839922192  }
   0x7   : > { %195 = vperm.xlu0 (!%p148_p2), %316, %v192_v0   ;;  %v198_v4 = vunpack.c.l.s4 (!%p148_p2), %v328_v3  ;;  %v201_v7 = vshrl.u32 (!%p148_p2), %v200_v5, 7 }
   0x9   : > { %v199_v6 = vunpack.c.0.s8 (!%p148_p2), %v198_v4 }
   0xb   : > { %317 = vset.pattern.permute.xlu0 (!%p148_p2), %v327_v2  ;;  %v202_v8 = vsub.s32 (!%p148_p2), %v199_v6, %v201_v7 }
   0xc   : > { %207 = vperm.xlu0 (!%p148_p2), %317, %v192_v0  }
   0xd   : > { %s377_s13 = smov (!%p176_p3, %s289_s13), 1 }
   0xe   : > { %s302_s16 = sshll.u32 %s377_s13, 3 }
   0xf   : > { %s180_s19 = scalar_lea.vmem %s372_s0, %s302_s16  ;;  %s185_s22 = scalar_lea.vmem %s373_s1, %s302_s16 }
  0x10   : > { %v191_v11 = vld [vmem:[%s180_s19] sm:$0xff]  ;;  %s190_s25 = scalar_lea.vmem %s375_s3, %s302_s16 }
  0x11   : > { %v218_v15 = vld [vmem:[%s185_s22] sm:$0xff] }
  0x86   : > { %v196_v9 = vpop.permute.xlu0 %195 }
  0x87   : > { %v203_v10 = vrot.slane %v196_v9, %v202_v8 }
  0x89   : > { %v205_v13 = vmul.f32 %v203_v10, %v191_v11 }
  0x8b   : > { %v208_v12 = vpop.permute.xlu0 %207 }
  0x8c   : > { %v215_v14 = vrot.slane %v208_v12, %v202_v8 }
  0x8e   : > { %v217_v16 = vadd.f32 %v215_v14, %v205_v13 }
  0x90   : > { %v219_v17 = vadd.f32 %v218_v15, %v217_v16 }
  0x92   : > { %v220_v18 = vmax.f32 %v219_v17, 0.0 }
  0x94   : > { %221 = vst [vmem:[%s190_s25] sm:$0xff] %v220_v18 }
  0x95 PF: > { %s13_s12 = sadd.s32 1, %s324_s12  }
  0x96   : > { %p10_p4 = scmp.ge.s32.totalorder %s13_s12, 4  }
  0x98   :  { %12 = sbr.rel (!%p10_p4) target bundleno = 1 (0x1), region = 65 }

// kernel: residual_block.3
= control target key start
LH: loop header
LB: loop body
LE: loop exit
PB: predicated region body
PF: predicated region fallthrough
CT: control target
= control target key end

     0   :  { %s791_s15 = smov 0   ;;  %s928_s0 = inlined_call_operand.vmem [shape: f32[2,8,256], index: 0, kind: input, shape index: {}]   ;;  %s929_s1 = inlined_call_operand.vmem [shape: f32[9,256], index: 1, kind: input, shape index: {}]   ;;  %s930_s2 = inlined_call_operand.vmem [shape: bf16[8,72], index: 2, kind: input, shape index: {}]   ;;  %s931_s3 = inlined_call_operand.vmem [shape: f32[2,8,256], index: 3, kind: output, shape index: {0}]   ;;  %s932_s4 = inlined_call_operand.vmem [shape: f32[2,4,2], index: 4, kind: output, shape index: {1}]  }
   0x1 LB: > { %s679_s16 = sadd.s32 4294967295, %s759_s15   ;;  %p683_p0 = scmp.ge.s32.totalorder %s759_s15, 1  ;;  %s759_s15 = sphi %s791_s15, %s15_s15  }
   0x2   : > { %p165_p1 = scmp.lt.s32.totalorder %s759_s15, 3 }
   0x4   : > { %p166_p2 = pnand %p683_p0, %p165_p1 }
   0x5   : > { %p195_p3 = scmp.lt.s32.totalorder (!%p166_p2), %s679_s16, 1  ;;  %s761_s21 = smov (!%p166_p2), 16   ;;  %v216_v2 = vlaneseq (!%p166_p2)  ;;  %v690_v6 = vld [vmem:[%s929_s1 + $0x1] ss:$8 sm:$0x3] (!%p166_p2)  ;;  %v765_v25 = vmov (!%p166_p2), 0  }
   0x6   : > { %169 = sbr.rel (%p166_p2) target bundleno = 646 (0x286), region = 32  ;;  %s762_s22 = smov (!%p166_p2), 112   ;;  %v701_v8 = vld [vmem:[%s929_s1 + $0x7] ss:$8 sm:$0x3] (!%p166_p2)  ;;  %564 = vmatprep.mubr.bf16.mxu0 (!%p166_p2), %v765_v25  ;;  %vm525_vm4 = vcmask (!%p166_p2), 1043456  }
   0x7   : > { %s763_s23 = smov (!%p166_p2), 1   ;;  %v231_v3 = vshrl.u32 (!%p166_p2), %v216_v2, 7  ;;  %v819_v4 = vand.u32 (!%p166_p2), 127, %v216_v2  ;;  %s764_s28 = smov (!%p166_p2), 127   ;;  %vm521_vm5 = vcmask (!%p166_p2), 588800   ;;  %vm582_vm6 = vcmask (!%p166_p2), 3072  }
   0x8   : > { %v228_v28 = vld [vmem:[%s929_s1] ss:$8 sm:$0x3] (!%p166_p2)  ;;  %v694_v29 = vld [vmem:[%s929_s1 + $0x3] ss:$8 sm:$0x3] (!%p166_p2) }
   0x9   : > { %v821_v5 = vsub.s32 (!%p166_p2), 1, %v231_v3  ;;  %v826_v7 = vsub.s32 (!%p166_p2), 0, %v231_v3  ;;  %vm218_vm0 = vcmp.lt.s32.totalorder (!%p166_p2), %v819_v4, 16  ;;  %vm379_vm1 = vcmp.lt.s32.totalorder (!%p166_p2), %v819_v4, 112 }
   0xa   : > { %v692_v32 = vld [vmem:[%s929_s1 + $0x2] ss:$8 sm:$0x3] (!%p166_p2)  ;;  %vm225_vm2 = vcmp.lt.s32.totalorder (!%p166_p2), %v819_v4, 1  ;;  %vm279_vm3 = vcmp.lt.s32.totalorder (!%p166_p2), %v819_v4, 127  ;;  %vm591_vm7 = vcmask (!%p166_p2), 11272  }
   0xb   : > { %v418_v11 = vrot.slane (!%p166_p2), %v701_v8, %v826_v7  ;;  %v422_v12 = vrot.slane (!%p166_p2), %v701_v8, %v821_v5  ;;  %v261_v13 = vrot.slane (!%p166_p2), %v690_v6, %v821_v5  ;;  %v257_v14 = vrot.slane (!%p166_p2), %v690_v6, %v826_v7  ;;  %v697_v43 = vld [vmem:[%s929_s1 + $0x5] ss:$8 sm:$0x3] (!%p166_p2)  ;;  %v699_v58 = vld [vmem:[%s929_s1 + $0x6] ss:$8 sm:$0x3] (!%p166_p2) }
   0xc   : > { %v233_v30 = vrot.slane (!%p166_p2), %v228_v28, %v826_v7  ;;  %v237_v31 = vrot.slane (!%p166_p2), %v228_v28, %v821_v5  ;;  %v318_v33 = vrot.slane (!%p166_p2), %v694_v29, %v826_v7  ;;  %v322_v36 = vrot.slane (!%p166_p2), %v694_v29, %v821_v5 }
   0xd   : > { %s934_s16 = smov (!%p195_p3, %s679_s16), 1  ;;  %v288_v40 = vrot.slane %v692_v32, %v826_v7  ;;  %v292_v41 = vrot.slane %v692_v32, %v821_v5  ;;  %v357_v52 = vrot.slane %v697_v43, %v826_v7  ;;  %v361_v53 = vrot.slane %v697_v43, %v821_v5 }
   0xe   : > { %s719_s17 = sshll.u32 %s934_s16, 4  ;;  %v394_v8 = vrot.slane %v699_v58, %v826_v7 }
   0xf   : > { %s199_s20 = scalar_lea.vmem %s928_s0, %s719_s17 }
  0x10   : > { %v807_v0 = vld [vmem:[%s199_s20] sm:$0xff]  ;;  %v811_v1 = vld [vmem:[%s199_s20 + $0x8] sm:$0xff] }
  0x11   : > { %212 = vrot.lane.b32.xlu0 %v807_v0, %s761_s21  ;;  %375 = vrot.lane.b32.xlu1 %v807_v0, %s762_s22 }
  0x15   : > { %214 = vrot.lane.b32.xlu0 %v811_v1, %s761_s21  ;;  %377 = vrot.lane.b32.xlu1 %v811_v1, %s762_s22  ;;  %s204_s22 = scalar_lea.vmem %s931_s3, %s719_s17  ;;  %s688_s17 = sshll.u32 %s934_s16, 2 }
  0x16   : > { %s208_s25 = scalar_lea.vmem %s932_s4, %s688_s17 }
  0x19   : > { %308 = vrot.lane.b32.xlu1 %v811_v1, %s763_s23  ;;  %306 = vrot.lane.b32.xlu0 %v807_v0, %s763_s23 }
  0x83   : > { %v213_v9 = vpop.permute.xlu0 %212  ;;  %v376_v10 = vpop.permute.xlu1 %375 }
  0x87   : > { %v215_v15 = vpop.permute.xlu0 %214  ;;  %v378_v16 = vpop.permute.xlu1 %377 }
  0x88   : > { %v220_v17 = vsel %vm218_vm0, %v215_v15, %v213_v9  ;;  %v219_v18 = vsel %vm218_vm0, %v213_v9, %v215_v15  ;;  %v380_v19 = vsel %vm379_vm1, %v376_v10, %v378_v16  ;;  %v381_v20 = vsel %vm379_vm1, %v378_v16, %v376_v10  ;;  %v703_v10 = vld [vmem:[%s929_s1 + $0x10] ss:$8 sm:$0x3] }
  0x89   : > { %221 = vrot.lane.b32.xlu0 %v220_v17, %s763_s23  ;;  %223 = vrot.lane.b32.xlu1 %v219_v18, %s763_s23  ;;  %v839_v21 = vmul.f32 %v418_v11, %v380_v19  ;;  %v841_v22 = vmul.f32 %v422_v12, %v381_v20  ;;  %v265_v23 = vmul.f32 %v261_v13, %v219_v18 }
  0x8a   : > { %v264_v24 = vmul.f32 %v257_v14, %v220_v17  ;;  %v398_v9 = vrot.slane %v699_v58, %v821_v5 }
  0x8b   : > { %v309_v26 = vpop.permute.xlu1 %308  ;;  %v307_v27 = vpop.permute.xlu0 %306 }
  0x8c   : > { %v310_v44 = vsel %vm225_vm2, %v307_v27, %v309_v26  ;;  %v311_v45 = vsel %vm225_vm2, %v309_v26, %v307_v27 }
  0x8d   : > { %275 = vrot.lane.b32.xlu0 %v220_v17, %s764_s28  ;;  %277 = vrot.lane.b32.xlu1 %v219_v18, %s764_s28  ;;  %v325_v54 = vmul.f32 %v318_v33, %v311_v45  ;;  %v326_v55 = vmul.f32 %v322_v36, %v310_v44 }
  0x91   : > { %345 = vrot.lane.b32.xlu0 %v807_v0, %s764_s28  ;;  %347 = vrot.lane.b32.xlu1 %v811_v1, %s764_s28 }
  0x95   : > { %382 = vrot.lane.b32.xlu0 %v380_v19, %s763_s23  ;;  %384 = vrot.lane.b32.xlu1 %v381_v20, %s763_s23 }
  0x99   : > { %436 = vrot.lane.b32.xlu0 %v380_v19, %s764_s28  ;;  %438 = vrot.lane.b32.xlu1 %v381_v20, %s764_s28  ;;  %v448_v19 = vrot.slane %v703_v10, %v826_v7  ;;  %v452_v20 = vrot.slane %v703_v10, %v821_v5 }
  0xfb   : > { %v224_v34 = vpop.permute.xlu1 %223  ;;  %v222_v35 = vpop.permute.xlu0 %221 }
  0xfc   : > { %v226_v37 = vsel %vm225_vm2, %v222_v35, %v224_v34  ;;  %v227_v38 = vsel %vm225_vm2, %v224_v34, %v222_v35 }
  0xfd   : > { %v240_v39 = vmul.f32 %v233_v30, %v227_v38  ;;  %v241_v42 = vmul.f32 %v237_v31, %v226_v37 }
  0xff   : > { %v278_v46 = vpop.permute.xlu1 %277  ;;  %v276_v47 = vpop.permute.xlu0 %275  ;;  %v731_v48 = vpack.c.bf16 %v265_v23, %v241_v42  ;;  %v730_v49 = vpack.c.bf16 %v264_v24, %v240_v39 }
 0x100   : > { %v280_v50 = vsel %vm279_vm3, %v276_v47, %v278_v46  ;;  %v281_v51 = vsel %vm279_vm3, %v278_v46, %v276_v47 }
 0x101   : > { %v295_v56 = vmul.f32 %v288_v40, %v280_v50  ;;  %v296_v57 = vmul.f32 %v292_v41, %v281_v51  ;;  %532 = vmatprep.subr.bf16.mxu0 %v731_v48 }
 0x102   : > { %533 = vmatpush1.bf16.msra.mxu0 %v730_v49 }
 0x103   : > { %v348_v59 = vpop.permute.xlu1 %347  ;;  %v346_v60 = vpop.permute.xlu0 %345  ;;  %v733_v61 = vpack.c.bf16 %v326_v55, %v296_v57  ;;  %v732_v62 = vpack.c.bf16 %v325_v54, %v295_v56 }
 0x104   : > { %v349_v63 = vsel %vm279_vm3, %v346_v60, %v348_v59  ;;  %v350_v2 = vsel %vm279_vm3, %v348_v59, %v346_v60 }
 0x105   : > { %v364_v3 = vmul.f32 %v357_v52, %v349_v63  ;;  %v365_v6 = vmul.f32 %v361_v53, %v350_v2  ;;  %534 = vmatprep.subr.bf16.mxu0 %v733_v61 }
 0x106   : > { %535 = vmatpush1.bf16.msra.mxu0 %v732_v62 }
 0x107   : > { %v385_v11 = vpop.permute.xlu1 %384  ;;  %v383_v12 = vpop.permute.xlu0 %382  ;;  %v735_v13 = vpack.c.bf16 %v365_v6, %v811_v1  ;;  %v734_v14 = vpack.c.bf16 %v364_v3, %v807_v0 }
 0x108   : > { %v386_v15 = vsel %vm225_vm2, %v383_v12, %v385_v11  ;;  %v387_v16 = vsel %vm225_vm2, %v385_v11, %v383_v12 }
 0x109   : > { %v401_v17 = vmul.f32 %v394_v8, %v387_v16  ;;  %v402_v18 = vmul.f32 %v398_v9, %v386_v15  ;;  %536 = vmatprep.subr.bf16.mxu0 %v735_v13 }
 0x10a   : > { %537 = vmatpush1.bf16.msra.mxu0 %v734_v14 }
 0x10b   : > { %v439_v23 = vpop.permute.xlu1 %438  ;;  %v437_v24 = vpop.permute.xlu0 %436  ;;  %v737_v1 = vpack.c.bf16 %v841_v22, %v402_v18  ;;  %v736_v0 = vpack.c.bf16 %v839_v21, %v401_v17  ;;  %v466_v21 = vld [vmem:[%s930_s2] sm:$0xf] }
 0x10c   : > { %v440_v25 = vsel %vm279_vm3, %v437_v24, %v439_v23  ;;  %v441_v26 = vsel %vm279_vm3, %v439_v23, %v437_v24 }
 0x10d   : > { %v455_v27 = vmul.f32 %v448_v19, %v440_v25  ;;  %v456_v28 = vmul.f32 %v452_v20, %v441_v26  ;;  %538 = vmatprep.subr.bf16.mxu0 %v737_v1 }
 0x10e   : > { %539 = vmatpush1.bf16.msra.mxu0 %v736_v0 }
 0x10f   : > { %v738_v5 = vpack.c.bf16 %v455_v27, %v455_v27  ;;  %v739_v7 = vpack.c.bf16 %v456_v28, %v456_v28 }
 0x111   : > { %715 = vmatprep.subr.msk.bf16.mxu0 %vm525_vm4, %v739_v7  ;;  %v527_v22 = vsel %vm525_vm4, %v738_v5, 0 }
 0x112   : > { %541 = vmatpush1.bf16.msra.mxu0 %v527_v22 }
 0x115   : > { %716 = vmatmul.mubr.msk.bf16.vlgmr.msra.gmra.mrb[0].mxu0 %vm521_vm5, %v466_v21 }
 0x1e8   : > { %v566_v4 = vpop.f32.mrb[0].mxu0 }
 0x1e9   : > { %573 = vst [vmem:[%s204_s22] sm:$0xff] %v566_v4  ;;  %v568_v29 = vpop.f32.mrb[1].mxu0 }
 0x1ea   : > { %574 = vst [vmem:[%s204_s22 + $0x8] sm:$0xff] %v568_v29  ;;  %v570_v30 = vpop.f32.mrb[2].mxu0 }
 0x1eb   : > { %v571_v31 = vpop.f32.mrb[3].mxu0 }
 0x1f0   : > { %v575_v32 = vld [vmem:[%s204_s22] sm:$0xf] }
 0x1f1   : > { %v576_v33 = vld [vmem:[%s204_s22 + $0x8] sm:$0xf]  ;;  %v577_v34 = vsel %vm525_vm4, %v575_v32, 0.0  ;;  %v584_v35 = vmul.f32 %v575_v32, %v575_v32 }
 0x1f2   : > { %v578_v36 = vsel %vm525_vm4, %v576_v33, 0.0  ;;  %v585_v37 = vmul.f32 %v576_v33, %v576_v33 }
 0x1f3   : > { %v579_v38 = vadd.f32 %v578_v36, %v577_v34  ;;  %v586_v39 = vsel %vm525_vm4, %v584_v35, 0.0 }
 0x1f4   : > { %v587_v40 = vsel %vm525_vm4, %v585_v37, 0.0 }
 0x1f5   : > { %580 = vadd.xlane.f32.xlu0 %v579_v38  ;;  %v588_v41 = vadd.f32 %v587_v40, %v586_v39 }
 0x1f7   : > { %589 = vadd.xlane.f32.xlu1 %v588_v41 }
 0x282   : > { %v581_v42 = vpop.xlane.xlu0 %580 }
 0x283   : > { %583 = vst.msk [vmem:[%s208_s25] sm:$0xf] %vm582_vm6, %v581_v42 }
 0x284   : > { %v590_v43 = vpop.xlane.xlu1 %589 }
 0x285   : > { %592 = vst.msk [vmem:[%s208_s25] sm:$0xf] %vm591_vm7, %v590_v43 }
 0x286 PF: > { %s15_s15 = sadd.s32 1, %s759_s15  }
 0x287   : > { %p12_p4 = scmp.ge.s32.totalorder %s15_s15, 4  }
 0x289   :  { %14 = sbr.rel (!%p12_p4) target bundleno = 1 (0x1), region = 81 }

// kernel: residual_block.4
= control target key start
LH: loop header
LB: loop body
LE: loop exit
PB: predicated region body
PF: predicated region fallthrough
CT: control target
= control target key end

     0   :  { %s851_s18 = smov 0   ;;  %s988_s0 = inlined_call_operand.vmem [shape: f32[2,8,256], index: 0, kind: input, shape index: {}]   ;;  %s989_s1 = inlined_call_operand.vmem [shape: f32[8,2], index: 1, kind: input, shape index: {}]   ;;  %s990_s2 = inlined_call_operand.vmem [shape: f32[9,256], index: 2, kind: input, shape index: {}]   ;;  %s991_s3 = inlined_call_operand.vmem [shape: bf16[4,72], index: 3, kind: input, shape index: {}]   ;;  %s992_s4 = inlined_call_operand.vmem [shape: f32[2,4,256], index: 4, kind: output, shape index: {0}]   ;;  %s993_s5 = inlined_call_operand.vmem [shape: f32[2,4,2], index: 5, kind: output, shape index: {1}]  }
   0x1 LB: > { %s729_s19 = sadd.s32 4294967295, %s813_s18   ;;  %p733_p0 = scmp.ge.s32.totalorder %s813_s18, 1  ;;  %s813_s18 = sphi %s851_s18, %s16_s18  }
   0x2   : > { %p190_p1 = scmp.lt.s32.totalorder %s813_s18, 3 }
   0x4   : > { %p191_p2 = pnand %p733_p0, %p190_p1 }
   0x5   : > { %v239_v0 = vld [vmem:[%s989_s1] sm:$0xff] (!%p191_p2)  ;;  %v815_v1 = vmov (!%p191_p2), 0   ;;  %v816_v2 = vmov (!%p191_p2), 1   ;;  %p222_p3 = scmp.lt.s32.totalorder (!%p191_p2), %s729_s19, 1  ;;  %s817_s26 = smov (!%p191_p2), 112   ;;  %v259_v13 = vlaneseq (!%p191_p2)  ;;  %vm568_vm4 = vcmask (!%p191_p2), 1043456  }
   0x6   : > { %194 = sbr.rel (%p191_p2) target bundleno = 769 (0x301), region = 36  ;;  %804 = vset.pattern.permute.xlu0 (!%p191_p2), %v815_v1  ;;  %607 = vmatprep.mubr.bf16.mxu0 (!%p191_p2), %v815_v1  ;;  %s818_s27 = smov (!%p191_p2), 16   ;;  %v740_v18 = vld [vmem:[%s990_s2 + $0x1] ss:$8 sm:$0x3] (!%p191_p2)  ;;  %vm564_vm5 = vcmask (!%p191_p2), 588800  }
   0x7   : > { %242 = vperm.xlu0 (!%p191_p2), %804, %v239_v0   ;;  %s819_s28 = smov (!%p191_p2), 1   ;;  %v274_v14 = vshrl.u32 (!%p191_p2), %v259_v13, 7  ;;  %v880_v15 = vand.u32 (!%p191_p2), 127, %v259_v13  ;;  %v751_v20 = vld [vmem:[%s990_s2 + $0x7] ss:$8 sm:$0x3] (!%p191_p2) }
   0x8   : > { %s820_s8 = smov (!%p191_p2), 127   ;;  %v271_v36 = vld [vmem:[%s990_s2] ss:$8 sm:$0x3] (!%p191_p2)  ;;  %vm630_vm6 = vcmask (!%p191_p2), 3072   ;;  %vm641_vm7 = vcmask (!%p191_p2), 11272  }
   0x9   : > { %v882_v16 = vsub.s32 (!%p191_p2), 0, %v274_v14  ;;  %v884_v17 = vsub.s32 (!%p191_p2), 1, %v274_v14  ;;  %vm261_vm0 = vcmp.lt.s32.totalorder (!%p191_p2), %v880_v15, 16  ;;  %vm422_vm1 = vcmp.lt.s32.totalorder (!%p191_p2), %v880_v15, 112 }
   0xa   : > { %v744_v39 = vld [vmem:[%s990_s2 + $0x3] ss:$8 sm:$0x3] (!%p191_p2)  ;;  %v742_v42 = vld [vmem:[%s990_s2 + $0x2] ss:$8 sm:$0x3] (!%p191_p2) }
   0xb   : > { %805 = vset.pattern.permute.xlu0 (!%p191_p2), %v816_v2  ;;  %v304_v21 = vrot.slane (!%p191_p2), %v740_v18, %v884_v17  ;;  %v300_v22 = vrot.slane (!%p191_p2), %v740_v18, %v882_v16  ;;  %v465_v26 = vrot.slane (!%p191_p2), %v751_v20, %v884_v17  ;;  %v461_v27 = vrot.slane (!%p191_p2), %v751_v20, %v882_v16  ;;  %v747_v53 = vld [vmem:[%s990_s2 + $0x5] ss:$8 sm:$0x3] (!%p191_p2)  ;;  %v753_v20 = vld [vmem:[%s990_s2 + $0x10] ss:$8 sm:$0x3] (!%p191_p2) }
   0xc   : > { %248 = vperm.xlu0 (!%p191_p2), %805, %v239_v0   ;;  %v276_v40 = vrot.slane (!%p191_p2), %v271_v36, %v882_v16  ;;  %v280_v41 = vrot.slane (!%p191_p2), %v271_v36, %v884_v17  ;;  %vm268_vm2 = vcmp.lt.s32.totalorder (!%p191_p2), %v880_v15, 1  ;;  %v361_v43 = vrot.slane (!%p191_p2), %v744_v39, %v882_v16 }
   0xd   : > { %s995_s19 = smov (!%p222_p3, %s729_s19), 1  ;;  %v365_v46 = vrot.slane %v744_v39, %v884_v17  ;;  %vm322_vm3 = vcmp.lt.s32.totalorder %v880_v15, 127  ;;  %v331_v50 = vrot.slane %v742_v42, %v882_v16  ;;  %v335_v51 = vrot.slane %v742_v42, %v884_v17 }
   0xe   : > { %s769_s22 = sshll.u32 %s995_s19, 4  ;;  %v400_v62 = vrot.slane %v747_v53, %v882_v16  ;;  %v404_v63 = vrot.slane %v747_v53, %v884_v17  ;;  %s738_s29 = sshll.u32 %s995_s19, 2 }
   0xf   : > { %s226_s25 = scalar_lea.vmem %s988_s0, %s769_s22  ;;  %s235_s7 = scalar_lea.vmem %s993_s5, %s738_s29 }
  0x10   : > { %v237_v4 = vld [vmem:[%s226_s25] sm:$0xff]  ;;  %v238_v5 = vld [vmem:[%s226_s25 + $0x8] sm:$0xff]  ;;  %s770_s25 = sshll.u32 %s995_s19, 3 }
  0x86   : > { %v243_v3 = vpop.permute.xlu0 %242 }
  0x87   : > { %v245_v6 = vmul.f32 %v243_v3, %v237_v4  ;;  %v246_v7 = vmul.f32 %v243_v3, %v238_v5  ;;  %v749_v4 = vld [vmem:[%s990_s2 + $0x6] ss:$8 sm:$0x3] }
  0x88   : > { %v437_v18 = vrot.slane %v749_v4, %v882_v16 }
  0x8b   : > { %v249_v8 = vpop.permute.xlu0 %248 }
  0x8c   : > { %v251_v9 = vadd.f32 %v249_v8, %v245_v6  ;;  %v252_v10 = vadd.f32 %v249_v8, %v246_v7 }
  0x8e   : > { %v868_v11 = vmax.f32 %v251_v9, 0.0  ;;  %v870_v12 = vmax.f32 %v252_v10, 0.0 }
  0x90   : > { %420 = vrot.lane.b32.xlu0 %v870_v12, %s817_s26  ;;  %255 = vrot.lane.b32.xlu1 %v868_v11, %s818_s27 }
  0x94   : > { %351 = vrot.lane.b32.xlu0 %v870_v12, %s819_s28  ;;  %257 = vrot.lane.b32.xlu1 %v870_v12, %s818_s27 }
  0x98   : > { %418 = vrot.lane.b32.xlu1 %v868_v11, %s817_s26 }
  0x9c   : > { %349 = vrot.lane.b32.xlu1 %v868_v11, %s819_s28 }
 0x102   : > { %v256_v19 = vpop.permute.xlu1 %255  ;;  %v421_v30 = vpop.permute.xlu0 %420 }
 0x106   : > { %v258_v23 = vpop.permute.xlu1 %257  ;;  %v352_v37 = vpop.permute.xlu0 %351 }
 0x107   : > { %v263_v24 = vsel %vm261_vm0, %v258_v23, %v256_v19  ;;  %v262_v25 = vsel %vm261_vm0, %v256_v19, %v258_v23  ;;  %v441_v19 = vrot.slane %v749_v4, %v884_v17 }
 0x108   : > { %264 = vrot.lane.b32.xlu1 %v263_v24, %s819_s28  ;;  %266 = vrot.lane.b32.xlu0 %v262_v25, %s819_s28  ;;  %v308_v28 = vmul.f32 %v304_v21, %v262_v25  ;;  %v307_v29 = vmul.f32 %v300_v22, %v263_v24 }
 0x10a   : > { %v419_v31 = vpop.permute.xlu1 %418 }
 0x10b   : > { %v424_v32 = vsel %vm422_vm1, %v421_v30, %v419_v31  ;;  %v423_v33 = vsel %vm422_vm1, %v419_v31, %v421_v30  ;;  %v495_v30 = vrot.slane %v753_v20, %v884_v17 }
 0x10c   : > { %318 = vrot.lane.b32.xlu1 %v263_v24, %s820_s8  ;;  %320 = vrot.lane.b32.xlu0 %v262_v25, %s820_s8  ;;  %v900_v34 = vmul.f32 %v465_v26, %v424_v32  ;;  %v902_v35 = vmul.f32 %v461_v27, %v423_v33 }
 0x10e   : > { %v350_v38 = vpop.permute.xlu1 %349 }
 0x10f   : > { %v353_v54 = vsel %vm268_vm2, %v350_v38, %v352_v37  ;;  %v354_v55 = vsel %vm268_vm2, %v352_v37, %v350_v38 }
 0x110   : > { %388 = vrot.lane.b32.xlu1 %v868_v11, %s820_s8  ;;  %390 = vrot.lane.b32.xlu0 %v870_v12, %s820_s8  ;;  %v368_v0 = vmul.f32 %v361_v43, %v354_v55  ;;  %v369_v1 = vmul.f32 %v365_v46, %v353_v54 }
 0x114   : > { %427 = vrot.lane.b32.xlu0 %v424_v32, %s819_s28  ;;  %425 = vrot.lane.b32.xlu1 %v423_v33, %s819_s28  ;;  %s231_s28 = scalar_lea.vmem %s992_s4, %s770_s25 }
 0x118   : > { %481 = vrot.lane.b32.xlu0 %v424_v32, %s820_s8  ;;  %479 = vrot.lane.b32.xlu1 %v423_v33, %s820_s8 }
 0x17a   : > { %v267_v44 = vpop.permute.xlu0 %266  ;;  %v265_v45 = vpop.permute.xlu1 %264 }
 0x17b   : > { %v269_v47 = vsel %vm268_vm2, %v265_v45, %v267_v44  ;;  %v270_v48 = vsel %vm268_vm2, %v267_v44, %v265_v45 }
 0x17c   : > { %v283_v49 = vmul.f32 %v276_v40, %v270_v48  ;;  %v284_v52 = vmul.f32 %v280_v41, %v269_v47 }
 0x17e   : > { %v321_v56 = vpop.permute.xlu0 %320  ;;  %v319_v57 = vpop.permute.xlu1 %318  ;;  %v781_v58 = vpack.c.bf16 %v308_v28, %v284_v52  ;;  %v780_v59 = vpack.c.bf16 %v307_v29, %v283_v49  ;;  %v491_v29 = vrot.slane %v753_v20, %v882_v16 }
 0x17f   : > { %v323_v60 = vsel %vm322_vm3, %v319_v57, %v321_v56  ;;  %v324_v61 = vsel %vm322_vm3, %v321_v56, %v319_v57 }
 0x180   : > { %v338_v2 = vmul.f32 %v331_v50, %v323_v60  ;;  %v339_v3 = vmul.f32 %v335_v51, %v324_v61  ;;  %575 = vmatprep.subr.bf16.mxu0 %v781_v58 }
 0x181   : > { %576 = vmatpush1.bf16.msra.mxu0 %v780_v59 }
 0x182   : > { %v391_v5 = vpop.permute.xlu0 %390  ;;  %v389_v6 = vpop.permute.xlu1 %388  ;;  %v783_v7 = vpack.c.bf16 %v369_v1, %v339_v3  ;;  %v782_v8 = vpack.c.bf16 %v368_v0, %v338_v2 }
 0x183   : > { %v392_v9 = vsel %vm322_vm3, %v389_v6, %v391_v5  ;;  %v393_v10 = vsel %vm322_vm3, %v391_v5, %v389_v6 }
 0x184   : > { %v407_v13 = vmul.f32 %v400_v62, %v392_v9  ;;  %v408_v14 = vmul.f32 %v404_v63, %v393_v10  ;;  %577 = vmatprep.subr.bf16.mxu0 %v783_v7 }
 0x185   : > { %578 = vmatpush1.bf16.msra.mxu0 %v782_v8 }
 0x186   : > { %v428_v21 = vpop.permute.xlu0 %427  ;;  %v426_v22 = vpop.permute.xlu1 %425  ;;  %v785_v23 = vpack.c.bf16 %v408_v14, %v870_v12  ;;  %v784_v24 = vpack.c.bf16 %v407_v13, %v868_v11 }
 0x187   : > { %v429_v25 = vsel %vm268_vm2, %v426_v22, %v428_v21  ;;  %v430_v26 = vsel %vm268_vm2, %v428_v21, %v426_v22 }
 0x188   : > { %v444_v27 = vmul.f32 %v437_v18, %v430_v26  ;;  %v445_v28 = vmul.f32 %v441_v19, %v429_v25  ;;  %579 = vmatprep.subr.bf16.mxu0 %v785_v23 }
 0x189   : > { %580 = vmatpush1.bf16.msra.mxu0 %v784_v24 }
 0x18a   : > { %v482_v31 = vpop.permute.xlu0 %481  ;;  %v480_v32 = vpop.permute.xlu1 %479  ;;  %v787_v12 = vpack.c.bf16 %v900_v34, %v445_v28  ;;  %v786_v11 = vpack.c.bf16 %v902_v35, %v444_v27  ;;  %v509_v35 = vld [vmem:[%s991_s3] sm:$0x3] }
 0x18b   : > { %v483_v33 = vsel %vm322_vm3, %v480_v32, %v482_v31  ;;  %v484_v36 = vsel %vm322_vm3, %v482_v31, %v480_v32 }
 0x18c   : > { %v498_v37 = vmul.f32 %v491_v29, %v483_v33  ;;  %v499_v38 = vmul.f32 %v495_v30, %v484_v36  ;;  %581 = vmatprep.subr.bf16.mxu0 %v787_v12 }
 0x18d   : > { %582 = vmatpush1.bf16.msra.mxu0 %v786_v11 }
 0x18e   : > { %v788_v16 = vpack.c.bf16 %v498_v37, %v498_v37  ;;  %v789_v17 = vpack.c.bf16 %v499_v38, %v499_v38 }
 0x190   : > { %765 = vmatprep.subr.msk.bf16.mxu0 %vm568_vm4, %v789_v17  ;;  %v570_v34 = vsel %vm568_vm4, %v788_v16, 0 }
 0x191   : > { %584 = vmatpush1.bf16.msra.mxu0 %v570_v34 }
 0x194   : > { %766 = vmatmul.mubr.msk.bf16.vlgmr.msra.gmra.mrb[0].mxu0 %vm564_vm5, %v509_v35 }
 0x267   : > { %v609_v15 = vpop.f32.mrb[0].mxu0 }
 0x268   : > { %v611_v39 = vpop.f32.mrb[1].mxu0 }
 0x269   : > { %v618_v40 = vcombine.low %v609_v15, %v611_v39  ;;  %v613_v41 = vpop.f32.mrb[2].mxu0  ;;  %v806_v43 = vcombine.low %v611_v39, %v611_v39 }
 0x26a   : > { %v614_v42 = vpop.f32.mrb[3].mxu0 }
 0x26b   : > { %620 = vst [vmem:[%s231_s28] sm:$0xff] %v618_v40  ;;  %v632_v44 = vmul.f32 %v618_v40, %v618_v40  ;;  %v625_v45 = vsel %vm568_vm4, %v618_v40, 0.0  ;;  %v626_v46 = vsel %vm568_vm4, %v806_v43, 0.0 }
 0x26c   : > { %v627_v48 = vadd.f32 %v626_v46, %v625_v45 }
 0x26d   : > { %v634_v47 = vcombine.high %v632_v44, %v632_v44  ;;  %v636_v49 = vsel %vm568_vm4, %v632_v44, 0.0 }
 0x26e   : > { %628 = vadd.xlane.f32.xlu1 %v627_v48 }
 0x26f   : > { %v637_v50 = vsel %vm568_vm4, %v634_v47, 0.0 }
 0x270   : > { %v638_v51 = vadd.f32 %v637_v50, %v636_v49 }
 0x272   : > { %639 = vadd.xlane.f32.xlu0 %v638_v51 }
 0x2fb   : > { %v629_v52 = vpop.xlane.xlu1 %628 }
 0x2fc   : > { %631 = vst.msk [vmem:[%s235_s7] sm:$0xf] %vm630_vm6, %v629_v52 }
 0x2ff   : > { %v640_v53 = vpop.xlane.xlu0 %639 }
 0x300   : > { %642 = vst.msk [vmem:[%s235_s7] sm:$0xf] %vm641_vm7, %v640_v53 }
 0x301 PF: > { %s16_s18 = sadd.s32 1, %s813_s18  }
 0x302   : > { %p13_p4 = scmp.ge.s32.totalorder %s16_s18, 4  }
 0x304   :  { %15 = sbr.rel (!%p13_p4) target bundleno = 1 (0x1), region = 85 }

</bundles_post_ra>
